<compile_context>
chip_gen: v5e
topology: v5e:2x2
jax: 0.10.0
libtpu: 0.0.40
codegen_flags: <defaults>
</compile_context>

<pallas_src>
import functools

import jax
import jax.numpy as jnp
from jax import lax
from jax.experimental import pallas as pl
from jax.experimental.pallas import tpu as pltpu


_NEG_BIG = -1e30  # finite "-inf" for masked (padded) key positions


def _flash_sdpa_kernel(q_ref, k_ref, v_ref, o_ref, m_ref, l_ref, acc_ref,
                       *, scale, lk_valid, block_k, mask_keys):
    kv = pl.program_id(2)

    # ---- init running max / sum / accumulator on the first KV tile ----------
    @pl.when(kv == 0)
    def _():
        m_ref[...] = jnp.full_like(m_ref[...], -jnp.inf)
        l_ref[...] = jnp.zeros_like(l_ref[...])
        acc_ref[...] = jnp.zeros_like(acc_ref[...])

    # Fold 1/sqrt(D) into q (touches Lq*D elements instead of Lq*Lk scores).
    # Matmuls stay in the input dtype; accumulation is f32 on the MXU.
    q = q_ref[0] * scale
    k = k_ref[0]
    v = v_ref[0]

    # Scores: contraction over the feature dim — no explicit k.T / XLU transpose.
    s = lax.dot_general(q, k, dimension_numbers=(((1,), (1,)), ((), ())),
                        preferred_element_type=jnp.float32)

    if mask_keys:  # static branch: only emitted when Lk was padded up to a tile multiple
        k_idx = kv * block_k + lax.broadcasted_iota(jnp.int32, s.shape, 1)
        s = jnp.where(k_idx < lk_valid, s, _NEG_BIG)

    # ---- online softmax update ----------------------------------------------
    m_prev = m_ref[...]
    m_new = jnp.maximum(m_prev, jnp.max(s, axis=-1, keepdims=True))
    alpha = jnp.exp(m_prev - m_new)
    p = jnp.exp(s - m_new)
    l_ref[...] = alpha * l_ref[...] + jnp.sum(p, axis=-1, keepdims=True)
    acc_ref[...] = alpha * acc_ref[...] + jnp.dot(
        p.astype(v.dtype), v, preferred_element_type=jnp.float32)
    m_ref[...] = m_new

    # ---- finalize: normalize the accumulator on the last KV tile ------------
    @pl.when(kv == pl.num_programs(2) - 1)
    def _():
        l = l_ref[...]
        inv_l = pl.reciprocal(l, approx=True)      # EUP slot (essentially free)
        inv_l = inv_l * (2.0 - l * inv_l)          # one Newton step -> near-exact parity
        o_ref[0] = (acc_ref[...] * inv_l).astype(o_ref.dtype)


def _round_up(x, m):
    return (x + m - 1) // m * m


def scaled_dot_product_attention(q, k, v, *, block_q=128, block_k=128):
    """q: [B, Lq, D], k: [B, Lk, D], v: [B, Lk, Dv] -> [B, Lq, Dv]."""
    B, Lq, D = q.shape
    Bk, Lk, Dk = k.shape
    Bv, Lkv, Dv = v.shape
    assert (B, D) == (Bk, Dk) and (B, Lk) == (Bv, Lkv)

    scale = 1.0 / (float(D) ** 0.5)  # torch temperature = np.power(dim, 0.5)

    # Tile sizes: sublane-aligned (x8), clamped to the (padded) sequence length.
    tq = min(block_q, _round_up(Lq, 8))
    tk = min(block_k, _round_up(Lk, 8))
    Lq_p = _round_up(Lq, tq)
    Lk_p = _round_up(Lk, tk)
    # Lane-dense feature dims (multiples of 128) -> unmasked vector loads/stores.
    D_p = _round_up(D, 128)
    Dv_p = _round_up(Dv, 128)

    qp = jnp.pad(q, ((0, 0), (0, Lq_p - Lq), (0, D_p - D)))
    kp = jnp.pad(k, ((0, 0), (0, Lk_p - Lk), (0, D_p - D)))
    vp = jnp.pad(v, ((0, 0), (0, Lk_p - Lk), (0, Dv_p - Dv)))

    grid = (B, Lq_p // tq, Lk_p // tk)

    kernel = functools.partial(
        _flash_sdpa_kernel,
        scale=scale, lk_valid=Lk, block_k=tk, mask_keys=(Lk_p != Lk))

    itemsize = jnp.dtype(q.dtype).itemsize
    # Double-buffered q/k/v/o tiles + f32 scratch, with headroom; clamped for v7x's 64 MiB VMEM.
    vmem_est = (2 * (tq * D_p + tk * D_p + tk * Dv_p + tq * Dv_p) * itemsize
                + (tq * Dv_p + 2 * tq) * 4)
    vmem_limit = int(min(max(4 * vmem_est, 16 * 1024 * 1024), 32 * 1024 * 1024))

    n_qb = Lq_p // tq
    cost = pl.CostEstimate(
        flops=2 * B * Lq_p * Lk_p * (D_p + Dv_p),
        transcendentals=B * Lq_p * Lk_p,
        bytes_accessed=(B * Lq_p * (D_p + Dv_p) * itemsize
                        + B * n_qb * Lk_p * (D_p + Dv_p) * itemsize),
    )

    out = pl.pallas_call(
        kernel,
        out_shape=jax.ShapeDtypeStruct((B, Lq_p, Dv_p), q.dtype),
        grid_spec=pltpu.PrefetchScalarGridSpec(
            num_scalar_prefetch=0,
            grid=grid,
            in_specs=[
                pl.BlockSpec((1, tq, D_p), lambda b, i, j: (b, i, 0)),
                pl.BlockSpec((1, tk, D_p), lambda b, i, j: (b, j, 0)),
                pl.BlockSpec((1, tk, Dv_p), lambda b, i, j: (b, j, 0)),
            ],
            out_specs=pl.BlockSpec((1, tq, Dv_p), lambda b, i, j: (b, i, 0)),
            scratch_shapes=[
                pltpu.VMEM((tq, 1), jnp.float32),     # running max
                pltpu.VMEM((tq, 1), jnp.float32),     # running sum
                pltpu.VMEM((tq, Dv_p), jnp.float32),  # output accumulator
            ],
        ),
        compiler_params=pltpu.CompilerParams(
            dimension_semantics=("parallel", "parallel", "arbitrary"),
            vmem_limit_bytes=vmem_limit,
        ),
        cost_estimate=cost,
    )(qp, kp, vp)

    return out[:, :Lq, :Dv]


def _reference(q, k, v):
    D = q.shape[-1]
    attn = jnp.einsum("bqd,bkd->bqk", q.astype(jnp.float32),
                      k.astype(jnp.float32)) / jnp.sqrt(jnp.float32(D))
    attn = jax.nn.softmax(attn, axis=-1)
    return jnp.einsum("bqk,bkd->bqd", attn, v.astype(jnp.float32)).astype(q.dtype)


if __name__ == "__main__":
    key = jax.random.PRNGKey(0)
    k1, k2, k3, k4, k5, k6 = jax.random.split(key, 6)

    # Case 1: shapes implied by the module's forward (aligned path).
    B, Lq, Lk, D, Dv = 2, 8, 8, 32, 32
    q = jax.random.normal(k1, (B, Lq, D), dtype=jnp.float32)
    k = jax.random.normal(k2, (B, Lk, D), dtype=jnp.float32)
    v = jax.random.normal(k3, (B, Lk, Dv), dtype=jnp.float32)
    out = jax.block_until_ready(scaled_dot_product_attention(q, k, v))
    ref = _reference(q, k, v)
    assert out.shape == (B, Lq, Dv)
    assert jnp.allclose(out, ref, atol=1e-4, rtol=1e-4), float(jnp.max(jnp.abs(out - ref)))

    # Case 2: ragged shapes exercising the padding + key-mask path.
    B2, Lq2, Lk2, D2, Dv2 = 2, 10, 13, 20, 24
    q2 = jax.random.normal(k4, (B2, Lq2, D2), dtype=jnp.float32)
    k2_ = jax.random.normal(k5, (B2, Lk2, D2), dtype=jnp.float32)
    v2 = jax.random.normal(k6, (B2, Lk2, Dv2), dtype=jnp.float32)
    out2 = jax.block_until_ready(scaled_dot_product_attention(q2, k2_, v2))
    ref2 = _reference(q2, k2_, v2)
    assert out2.shape == (B2, Lq2, Dv2)
    assert jnp.allclose(out2, ref2, atol=1e-4, rtol=1e-4), float(jnp.max(jnp.abs(out2 - ref2)))

    print("KERNEL_OK")
</pallas_src>

<mosaic_0001>
module attributes {stable_mosaic.version = 11 : i64} {
  func.func @_flash_sdpa_kernel(%arg0: i32, %arg1: i32, %arg2: i32, %arg3: memref<1x8x128xf32, #tpu.memory_space<vmem>>, %arg4: memref<1x8x128xf32, #tpu.memory_space<vmem>>, %arg5: memref<1x8x128xf32, #tpu.memory_space<vmem>>, %arg6: memref<1x8x128xf32, #tpu.memory_space<vmem>>, %arg7: memref<8x1xf32, #tpu.memory_space<vmem>>, %arg8: memref<8x1xf32, #tpu.memory_space<vmem>>, %arg9: memref<8x128xf32, #tpu.memory_space<vmem>>) attributes {dimension_semantics = [#tpu.dimension_semantics<parallel>, #tpu.dimension_semantics<parallel>, #tpu.dimension_semantics<arbitrary>], iteration_bounds = array<i64: 2, 1, 1>, scalar_prefetch = 0 : i64, scratch_operands = 3 : i64, tpu.core_type = #tpu.core_type<tc>, window_params = [{transform_indices = @transform_0, window_bounds = array<i64: 1, 8, 128>}, {transform_indices = @transform_1, window_bounds = array<i64: 1, 8, 128>}, {transform_indices = @transform_2, window_bounds = array<i64: 1, 8, 128>}, {transform_indices = @transform_3, window_bounds = array<i64: 1, 8, 128>}]} {
    %c0_i32 = arith.constant 0 : i32
    %0 = arith.cmpi eq, %arg2, %c0_i32 : i32
    %1 = arith.extui %0 : i1 to i32
    %c0_i32_0 = arith.constant 0 : i32
    %2 = arith.cmpi ne, %1, %c0_i32_0 : i32
    scf.if %2 {
      %cst_27 = arith.constant 0xFF800000 : f32
      %37 = vector.broadcast %cst_27 : f32 to vector<8x1xf32>
      %c0_28 = arith.constant 0 : index
      %c0_29 = arith.constant 0 : index
      %38 = vector.load %arg7[%c0_28, %c0_29] : memref<8x1xf32, #tpu.memory_space<vmem>>, vector<8x1xf32>
      tpu.vector_store %arg7[%c0_28, %c0_29], %37 {strides = array<i32>} : memref<8x1xf32, #tpu.memory_space<vmem>>, vector<8x1xf32>,
      %cst_30 = arith.constant 0.000000e+00 : f32
      %39 = vector.broadcast %cst_30 : f32 to vector<8x1xf32>
      %c0_31 = arith.constant 0 : index
      %c0_32 = arith.constant 0 : index
      %40 = vector.load %arg8[%c0_31, %c0_32] : memref<8x1xf32, #tpu.memory_space<vmem>>, vector<8x1xf32>
      tpu.vector_store %arg8[%c0_31, %c0_32], %39 {strides = array<i32>} : memref<8x1xf32, #tpu.memory_space<vmem>>, vector<8x1xf32>,
      %cst_33 = arith.constant 0.000000e+00 : f32
      %41 = vector.broadcast %cst_33 : f32 to vector<8x128xf32>
      %c0_34 = arith.constant 0 : index
      %c0_35 = arith.constant 0 : index
      %42 = vector.load %arg9[%c0_34, %c0_35] : memref<8x128xf32, #tpu.memory_space<vmem>>, vector<8x128xf32>
      tpu.vector_store %arg9[%c0_34, %c0_35], %41 {strides = array<i32>} : memref<8x128xf32, #tpu.memory_space<vmem>>, vector<8x128xf32>,
    } else {
    }
    %c0 = arith.constant 0 : index
    %c0_1 = arith.constant 0 : index
    %c0_2 = arith.constant 0 : index
    %3 = vector.load %arg3[%c0, %c0_1, %c0_2] : memref<1x8x128xf32, #tpu.memory_space<vmem>>, vector<1x8x128xf32>
    %4 = vector.shape_cast %3 : vector<1x8x128xf32> to vector<8x128xf32>
    %cst = arith.constant 0.176776692 : f32
    %5 = vector.broadcast %cst : f32 to vector<8x128xf32>
    %6 = arith.mulf %4, %5 : vector<8x128xf32>
    %c0_3 = arith.constant 0 : index
    %c0_4 = arith.constant 0 : index
    %c0_5 = arith.constant 0 : index
    %7 = vector.load %arg4[%c0_3, %c0_4, %c0_5] : memref<1x8x128xf32, #tpu.memory_space<vmem>>, vector<1x8x128xf32>
    %8 = vector.shape_cast %7 : vector<1x8x128xf32> to vector<8x128xf32>
    %c0_6 = arith.constant 0 : index
    %c0_7 = arith.constant 0 : index
    %c0_8 = arith.constant 0 : index
    %9 = vector.load %arg5[%c0_6, %c0_7, %c0_8] : memref<1x8x128xf32, #tpu.memory_space<vmem>>, vector<1x8x128xf32>
    %10 = vector.shape_cast %9 : vector<1x8x128xf32> to vector<8x128xf32>
    %cst_9 = arith.constant dense<0.000000e+00> : vector<8x8xf32>
    %11 = tpu.matmul %6, %8, %cst_9 {dimension_numbers = #tpu.dot_dimension_numbers<[1], [1], [0], [0], [0, 0, 1, 0], [], []>} : vector<8x128xf32>, vector<8x128xf32>, vector<8x8xf32> -> vector<8x8xf32>
    %c0_10 = arith.constant 0 : index
    %c0_11 = arith.constant 0 : index
    %12 = vector.load %arg7[%c0_10, %c0_11] : memref<8x1xf32, #tpu.memory_space<vmem>>, vector<8x1xf32>
    %cst_12 = arith.constant dense<0xFF800000> : vector<8xf32>
    %13 = vector.multi_reduction <maximumf>, %11, %cst_12 [1] : vector<8x8xf32> to vector<8xf32>
    %14 = vector.shape_cast %13 : vector<8xf32> to vector<8x1xf32>
    %15 = arith.maximumf %12, %14 : vector<8x1xf32>
    %16 = arith.subf %12, %15 : vector<8x1xf32>
    %17 = math.exp %16 : vector<8x1xf32>
    %18 = vector.broadcast %15 : vector<8x1xf32> to vector<8x8xf32>
    %19 = arith.subf %11, %18 : vector<8x8xf32>
    %20 = math.exp %19 : vector<8x8xf32>
    %c0_13 = arith.constant 0 : index
    %c0_14 = arith.constant 0 : index
    %21 = vector.load %arg8[%c0_13, %c0_14] : memref<8x1xf32, #tpu.memory_space<vmem>>, vector<8x1xf32>
    %22 = arith.mulf %17, %21 : vector<8x1xf32>
    %cst_15 = arith.constant dense<0.000000e+00> : vector<8xf32>
    %23 = vector.multi_reduction <add>, %20, %cst_15 [1] : vector<8x8xf32> to vector<8xf32>
    %24 = vector.shape_cast %23 : vector<8xf32> to vector<8x1xf32>
    %25 = arith.addf %22, %24 : vector<8x1xf32>
    %c0_16 = arith.constant 0 : index
    %c0_17 = arith.constant 0 : index
    %26 = vector.load %arg8[%c0_16, %c0_17] : memref<8x1xf32, #tpu.memory_space<vmem>>, vector<8x1xf32>
    tpu.vector_store %arg8[%c0_16, %c0_17], %25 {strides = array<i32>} : memref<8x1xf32, #tpu.memory_space<vmem>>, vector<8x1xf32>,
    %c0_18 = arith.constant 0 : index
    %c0_19 = arith.constant 0 : index
    %27 = vector.load %arg9[%c0_18, %c0_19] : memref<8x128xf32, #tpu.memory_space<vmem>>, vector<8x128xf32>
    %28 = vector.broadcast %17 : vector<8x1xf32> to vector<8x128xf32>
    %29 = arith.mulf %28, %27 : vector<8x128xf32>
    %cst_20 = arith.constant dense<0.000000e+00> : vector<8x128xf32>
    %30 = tpu.matmul %20, %10, %cst_20 {dimension_numbers = #tpu.dot_dimension_numbers<[1], [0], [0], [1], [0, 0, 1, 1], [], []>} : vector<8x8xf32>, vector<8x128xf32>, vector<8x128xf32> -> vector<8x128xf32>
    %31 = arith.addf %29, %30 : vector<8x128xf32>
    %c0_21 = arith.constant 0 : index
    %c0_22 = arith.constant 0 : index
    %32 = vector.load %arg9[%c0_21, %c0_22] : memref<8x128xf32, #tpu.memory_space<vmem>>, vector<8x128xf32>
    tpu.vector_store %arg9[%c0_21, %c0_22], %31 {strides = array<i32>} : memref<8x128xf32, #tpu.memory_space<vmem>>, vector<8x128xf32>,
    %c0_23 = arith.constant 0 : index
    %c0_24 = arith.constant 0 : index
    %33 = vector.load %arg7[%c0_23, %c0_24] : memref<8x1xf32, #tpu.memory_space<vmem>>, vector<8x1xf32>
    tpu.vector_store %arg7[%c0_23, %c0_24], %15 {strides = array<i32>} : memref<8x1xf32, #tpu.memory_space<vmem>>, vector<8x1xf32>,
    %c0_i32_25 = arith.constant 0 : i32
    %34 = arith.cmpi eq, %arg2, %c0_i32_25 : i32
    %35 = arith.extui %34 : i1 to i32
    %c0_i32_26 = arith.constant 0 : i32
    %36 = arith.cmpi ne, %35, %c0_i32_26 : i32
    scf.if %36 {
      %c0_27 = arith.constant 0 : index
      %c0_28 = arith.constant 0 : index
      %37 = vector.load %arg8[%c0_27, %c0_28] : memref<8x1xf32, #tpu.memory_space<vmem>>, vector<8x1xf32>
      %38 = tpu.reciprocal %37 {approx = true} : vector<8x1xf32> -> vector<8x1xf32>
      %39 = arith.mulf %37, %38 : vector<8x1xf32>
      %cst_29 = arith.constant 2.000000e+00 : f32
      %40 = vector.broadcast %cst_29 : f32 to vector<8x1xf32>
      %41 = arith.subf %40, %39 : vector<8x1xf32>
      %42 = arith.mulf %38, %41 : vector<8x1xf32>
      %c0_30 = arith.constant 0 : index
      %c0_31 = arith.constant 0 : index
      %43 = vector.load %arg9[%c0_30, %c0_31] : memref<8x128xf32, #tpu.memory_space<vmem>>, vector<8x128xf32>
      %44 = vector.broadcast %42 : vector<8x1xf32> to vector<8x128xf32>
      %45 = arith.mulf %43, %44 : vector<8x128xf32>
      %c0_32 = arith.constant 0 : index
      %c0_33 = arith.constant 0 : index
      %c0_34 = arith.constant 0 : index
      %46 = vector.load %arg6[%c0_32, %c0_33, %c0_34] : memref<1x8x128xf32, #tpu.memory_space<vmem>>, vector<1x8x128xf32>
      %47 = vector.shape_cast %46 : vector<1x8x128xf32> to vector<8x128xf32>
      %48 = vector.shape_cast %45 : vector<8x128xf32> to vector<1x8x128xf32>
      tpu.vector_store %arg6[%c0_32, %c0_33, %c0_34], %48 {strides = array<i32>} : memref<1x8x128xf32, #tpu.memory_space<vmem>>, vector<1x8x128xf32>,
    } else {
    }
    return
  }
  func.func @transform_0(%arg0: i32, %arg1: i32, %arg2: i32) -> (i32, i32, i32) {
    %c0_i32 = arith.constant 0 : i32
    %c0_i32_0 = arith.constant 0 : i32
    return %arg0, %arg1, %c0_i32 : i32, i32, i32
  }
  func.func @transform_1(%arg0: i32, %arg1: i32, %arg2: i32) -> (i32, i32, i32) {
    %c0_i32 = arith.constant 0 : i32
    %c0_i32_0 = arith.constant 0 : i32
    return %arg0, %arg2, %c0_i32 : i32, i32, i32
  }
  func.func @transform_2(%arg0: i32, %arg1: i32, %arg2: i32) -> (i32, i32, i32) {
    %c0_i32 = arith.constant 0 : i32
    %c0_i32_0 = arith.constant 0 : i32
    return %arg0, %arg2, %c0_i32 : i32, i32, i32
  }
  func.func @transform_3(%arg0: i32, %arg1: i32, %arg2: i32) -> (i32, i32, i32) {
    %c0_i32 = arith.constant 0 : i32
    %c0_i32_0 = arith.constant 0 : i32
    return %arg0, %arg1, %c0_i32 : i32, i32, i32
  }
}

</mosaic_0001>

<bundles_post_ra>
// kernel: tpu_custom_call.1
= control target key start
LH: loop header
LB: loop body
LE: loop exit
PB: predicated region body
PF: predicated region fallthrough
CT: control target
= control target key end

     0   :  { %s1014_s0 = inlined_call_operand.hbm [shape: f32[2,8,128], index: 0, kind: input, shape index: {}]   ;;  %s1015_s1 = inlined_call_operand.hbm [shape: f32[2,8,128], index: 1, kind: input, shape index: {}]   ;;  %s1016_s2 = inlined_call_operand.hbm [shape: f32[2,8,128], index: 2, kind: input, shape index: {}]   ;;  %s1017_s3 = inlined_call_operand.hbm [shape: f32[2,8,128], index: 3, kind: output, shape index: {}]  }
   0x1   :  { %1020 = sst [smem:[#allocation18_spill]] %s1015_s1 }
   0x2   :  { %8 = vsyncpa [#allocation6], 0 }
   0x3   :  { %10 = vsyncpa [#allocation6 + $0x1], 0 }
   0x4   :  { %11 = vsyncpa [#allocation9], 0 }
   0x5   :  { %13 = vsyncpa [#allocation9 + $0x1], 0 }
   0x6   :  { %14 = vsyncpa [#allocation7], 0 }
   0x7   :  { %16 = vsyncpa [#allocation7 + $0x1], 0  ;;  %s849_s12 = smov 0   ;;  %s851_s13 = smov 0  }
   0x8   :  { %s853_s14 = smov 0   ;;  %s855_s15 = smov 0  }
   0x9   :  { %s857_s16 = smov 0   ;;  %s859_s17 = smov 0  }
   0xa LB: > { %1021 = sst [smem:[#allocation15_spill]] %s820_s16  ;;  %s880_s18 = sadd.s32 4294967295, %s824_s17   ;;  %s824_s17 = sphi %s859_s17, %s22_s17   ;;  %s820_s16 = sphi %s857_s16, %s1033_s16   ;;  %s816_s15 = sphi %s855_s15, %s1032_s15   ;;  %s812_s14 = sphi %s853_s14, %s1036_s14   ;;  %s808_s13 = sphi %s851_s13, %s1035_s13   ;;  %s804_s12 = sphi %s849_s12, %s1034_s12  }
   0xb   : > { %s545_s19 = sadd.s32 4294967294, %s824_s17   ;;  %s41_s20 = sadd.s32 1, %s820_s16 }
   0xc   : > { %s50_s21 = sadd.s32 1, %s812_s14  ;;  %p43_p0 = scmp.ge.s32.totalorder %s41_s20, 2 }
   0xd   : > { %p57_p1 = scmp.ne.s32.totalorder %s812_s14, %s808_s13  ;;  %p58_p2 = scmp.eq.s32.totalorder %s824_s17, 0 }
   0xe   : > { %p63_p3 = scmp.ne.s32.totalorder %s808_s13, %s804_s12  ;;  %s1038_s20 = smov (%p43_p0, %s41_s20), 0 }
   0xf   : > { %1022 = sst [smem:[#allocation16_spill]] %s1038_s20  ;;  %p892_p4 = por %p58_p2, %p57_p1 }
  0x10   : > { %p64_p5 = scmp.eq.s32.totalorder %s880_s18, 0  ;;  %s45_s23 = ssub.s32 %s820_s16, %s1038_s20 }
  0x11   : > { %p145_p6 = scmp.eq.s32.totalorder %s880_s18, 1  ;;  %p48_p7 = scmp.eq.s32.totalorder %s45_s23, 0 }
  0x12   : > { %p900_p8 = por %p64_p5, %p63_p3  ;;  %p151_p10 = scmp.eq.s32.totalorder %s545_s19, 1 }
  0x13   : > { %p904_p9 = por %p145_p6, %p57_p1  ;;  %p547_p12 = scmp.ge.s32.totalorder %s824_s17, 2 }
  0x14   : > { %s909_s26 = scalar_select %p48_p7, %s812_s14, %s50_s21  }
  0x15   : > { %p911_p11 = por %p151_p10, %p63_p3  ;;  %p586_p13 = scmp.lt.s32.totalorder %s824_s17, 2 }
  0x16   : > { %1026 = sst [smem:[#allocation17_spill]] %s909_s26  ;;  %s171_s28 = sand.u32 1, %s812_s14  }
  0x17   : > { %s548_s29 = sshll.u32 %s171_s28, 3  ;;  %s549_s30 = sshll.u32 %s820_s16, 3 }
  0x18   : > { %p921_p0 = pnand %p586_p13, %p892_p4  ;;  %s191_s5 = sand.u32 1, %s824_s17  }
  0x19   : > { %s1029_s1 = sld [smem:[#allocation18_spill]]  ;;  %s195_s10 = scalar_lea.vmem [#allocation8], %s548_s29 }
  0x1a   : > { %s204_s11 = sshll.u32 %s195_s10, 4  ;;  %s192_s19 = scalar_lea.sflag [#allocation9], %s191_s5  ;;  %s205_s11 = int_to_ptr.vmem [resolvable:$true] %s204_s11 }
  0x1b   : > { %p554_p1 = scmp.ge.s32.totalorder %s824_s17, 1  ;;  %p229_p2 = scmp.lt.s32.totalorder %s824_s17, 3 }
  0x1c   : > { %s180_s6 = scalar_lea.hbm %s1014_s0, %s549_s30  ;;  %s172_s10 = scalar_lea.sflag [#allocation6], %s171_s28 }
  0x1d   : > { %p933_p3 = pnand %p554_p1, %p229_p2  ;;  %s182_s7 = sshll.u32 %s180_s6, 4  ;;  %s183_s7 = int_to_ptr.hbm [resolvable:$true] %s182_s7 }
  0x1e   : > { %s215_s16 = scalar_lea.vmem [#allocation10], %s548_s29  ;;  %s950_s22 = sand.u32 (!%p933_p3), 1, %s808_s13  }
  0x1f   : > { %s200_s8 = scalar_lea.hbm %s1029_s1, %s549_s30  ;;  %s224_s26 = sshll.u32 %s215_s16, 4  ;;  %s225_s26 = int_to_ptr.vmem [resolvable:$true] %s224_s26 }
  0x20   : > { %s202_s9 = sshll.u32 %s200_s8, 4  ;;  %s175_s8 = scalar_lea.vmem [#allocation5], %s548_s29  ;;  %s203_s9 = int_to_ptr.hbm [resolvable:$true] %s202_s9 }
  0x21   : > { %578 = dma.hbm_to_vmem [thread:$0]  (!%p921_p0), %s203_s9, 128, %s205_s11, %s192_s19  }
  0x22   : > { %s184_s1 = sshll.u32 %s175_s8, 4  ;;  %s220_s11 = scalar_lea.hbm %s1016_s2, %s549_s30  ;;  %s185_s1 = int_to_ptr.vmem [resolvable:$true] %s184_s1 }
  0x23   : > { %575 = dma.hbm_to_vmem [thread:$0]  (!%p921_p0), %s183_s7, 128, %s185_s1, %s172_s10  }
  0x24   : > { %s222_s20 = sshll.u32 %s220_s11, 4  ;;  %233 = sbr.rel (%p933_p3) target bundleno = 656 (0x290), region = 32  ;;  %s223_s20 = int_to_ptr.hbm [resolvable:$true] %s222_s20 }
  0x25   : > { %581 = dma.hbm_to_vmem [thread:$0]  (!%p921_p0), %s223_s20, 128, %s225_s26, %s192_s19  }
  0x26   : > { %s953_s1 = sshll.u32 (!%p933_p3), %s950_s22, 3  ;;  %s236_s28 = scalar_lea.sflag (!%p933_p3), [#allocation6], %s950_s22 }
  0x27   : > { %s239_s30 = scalar_lea.vmem (!%p933_p3), [#allocation5], %s953_s1 }
  0x29   : > { %791 = dma.done.wait (%p900_p8), %s236_s28, 128  }
  0x2a   : > { %793 = vsyncadd (%p900_p8), %s236_s28, 4294967168  ;;  %s245_s16 = sand.u32 1, %s880_s18   ;;  %s249_s26 = scalar_lea.vmem [#allocation8], %s953_s1 }
  0x2b   : > { %s246_s20 = scalar_lea.sflag [#allocation9], %s245_s16 }
  0x2c   : > { %795 = dma.done.wait (%p900_p8), %s246_s20, 256  }
  0x2d   : > { %797 = vsyncadd (%p900_p8), %s246_s20, 4294967040  ;;  %v303_v0 = vld [vmem:[%s249_s26] sm:$0xff]  ;;  %v301_v1 = vld [vmem:[%s239_s30] sm:$0xff]  ;;  %vm297_vm0 = vcmask 7168   ;;  %v826_v3 = vmov -inf   ;;  %vm326_vm1 = vcmask 64512  }
  0x2e   : > { %320 = vmatpush.xpose.msra.mxu0 %v303_v0  ;;  %v302_v2 = vmul.f32 0.17677669, %v301_v1  ;;  %298 = vst.msk [vmem:[#allocation2] sm:$0xff] %vm297_vm0, %v826_v3  ;;  %v827_v6 = vmov 0   ;;  %v828_v7 = vmov 0.0   ;;  %s259_s18 = scalar_lea.vmem [#allocation10], %s953_s1 }
  0x2f   : > { %639 = vset.pattern.permute.xlu0 %v827_v6  ;;  %640 = vset.pattern.permute.xlu1 %v827_v6  ;;  %299 = vst.msk [vmem:[#allocation3] sm:$0xff] %vm297_vm0, %v828_v7  ;;  %v304_v12 = vld [vmem:[%s259_s18] sm:$0xff]  ;;  %s561_s24 = sshll.u32 %s816_s15, 3  ;;  %s292_s21 = scalar_lea.vmem [#allocation11], %s953_s1 }
  0x30   : > { %641 = vset.pattern.permute.xlu2 %v827_v6  ;;  %375 = vmatpush.msra.mxu1 %v304_v12  ;;  %s411_s19 = scalar_lea.hbm %s1017_s3, %s561_s24  ;;  %s413_s23 = sshll.u32 %s292_s21, 4  ;;  %s414_s23 = int_to_ptr.vmem [resolvable:$true] %s413_s23 }
  0x31   : > { %321 = vmatmul.f32.vlgmr.msra.gmra.mxu0 %v302_v2  ;;  %s415_s6 = sshll.u32 %s411_s19, 4  ;;  %s400_s7 = scalar_lea.sflag [#allocation7], %s950_s22  ;;  %s416_s6 = int_to_ptr.hbm [resolvable:$true] %s415_s6 }
  0x32   : > { %s752_s8 = sshra.s32 %s416_s6, 4  ;;  %s758_s9 = scalar_lea.hbm %s1017_s3, 16  ;;  %s753_s8 = int_to_ptr.hbm [resolvable:$true] %s752_s8 }
  0x33   : > { %s754_s15 = scalar_lea.hbm %s753_s8, 8  ;;  %p759_p7 = scmp.lt.s32.totalorder %s753_s8, %s1017_s3 }
  0x34   : > { %p755_p4 = scmp.ne.s32.totalorder %s753_s8, %s754_s15  ;;  %p760_p8 = scmp.lt.s32.totalorder %s758_s9, %s754_s15 }
  0x35   : > { %v325_v8 = vld [vmem:[#allocation2] sm:$0xff] }
  0x36   : > { %v342_v20 = vld [vmem:[#allocation3] sm:$0xff]  ;;  %p756_p5 = pnand %p755_p4, %p904_p9  ;;  %p761_p10 = por %p760_p8, %p759_p7 }
  0x38   : > { %p757_p6 = pneg %p756_p5 }
  0x3a   : > { %p762_p13 = pnand %p761_p10, %p757_p6 }
  0xae   : > { %v322_v4 = vpop.f32.mrf.mxu0 }
  0xaf   : > { %v327_v5 = vsel %vm326_vm1, %v322_v4, -inf }
  0xb0   : > { %328 = vmax.xlane.f32.xlu0 %v327_v5 }
 0x123   : > { %v329_v9 = vpop.xlane.xlu0 %328 }
 0x124   : > { %v330_v10 = vmax.f32 %v325_v8, %v329_v9 }
 0x126   : > { %v331_v11 = vsub.f32 %v325_v8, %v330_v10  ;;  %382 = vst.msk [vmem:[#allocation2] sm:$0xff] %vm297_vm0, %v330_v10  ;;  %336 = vperm.xlu0 %639, %v330_v10  }
 0x128   : > { %v332_v18 = vmul.f32 1.442695, %v331_v11 }
 0x198   : > { %v337_v13 = vpop.permute.xlu0 %336 }
 0x199   : > { %v339_v14 = vsub.f32 %v322_v4, %v337_v13 }
 0x19b   : > { %v340_v15 = vmul.f32 1.442695, %v339_v14 }
 0x19d   : > { %642 = vpow2.f32 %v340_v15 }
 0x19e   : > { %644 = vpow2.f32 %v332_v18 }
 0x1a3   : > { %v643_v16 = vpop.eup %642 }
 0x1a4   : > { %559 = vmatmul.msk.f32.vlgmr.msra.gmra.mxu1 %vm326_vm1, %v643_v16  ;;  %v344_v17 = vsel %vm326_vm1, %v643_v16, 0.0  ;;  %v645_v19 = vpop.eup %644 }
 0x1a5   : > { %345 = vadd.xlane.f32.xlu1 %v344_v17  ;;  %v343_v21 = vmul.f32 %v645_v19, %v342_v20 }
 0x1be   : > { %353 = vperm.xlu1 %640, %v645_v19  }
 0x218   : > { %v346_v22 = vpop.xlane.xlu1 %345 }
 0x219   : > { %v347_v23 = vadd.f32 %v346_v22, %v343_v21 }
 0x21b   : > { %349 = vst.msk [vmem:[#allocation3] sm:$0xff] %vm297_vm0, %v347_v23 }
 0x221   : > { %v377_v31 = vpop.f32.mrf.mxu1 }
 0x222   : > { %v386_v24 = vld [vmem:[#allocation3] sm:$0xff] }
 0x223   : > { %646 = vrcp.f32 %v386_v24 }
 0x229   : > { %v647_v25 = vpop.eup %646 }
 0x22a   : > { %v388_v26 = vmul.f32 %v647_v25, %v386_v24 }
 0x22c   : > { %v389_v27 = vsub.f32 2.0, %v388_v26 }
 0x22e   : > { %v390_v28 = vmul.f32 %v647_v25, %v389_v27 }
 0x230   : > { %394 = vperm.xlu2 %641, %v390_v28   ;;  %v354_v29 = vpop.permute.xlu1 %353 }
 0x231   : > { %v356_v30 = vmul.f32 0.0, %v354_v29 }
 0x233   : > { %v380_v32 = vadd.f32 %v377_v31, %v356_v30 }
 0x28a   : > { %v395_v33 = vpop.permute.xlu2 %394 }
 0x28b   : > { %v397_v34 = vmul.f32 %v395_v33, %v380_v32 }
 0x28d   : > { %398 = vst [vmem:[%s292_s21] sm:$0xff] %v397_v34 }
 0x28e   : > { %765 = shalt.err (!%p762_p13)
}
 0x28f   : > { %570 = dma.vmem_to_hbm [thread:$0]  (%p904_p9), %s414_s23, 128, %s416_s6, %s400_s7  }
 0x290 PF: > { %s427_s22 = sand.u32 1, %s804_s12   ;;  %p583_p0 = pnand %p547_p12, %p911_p11 }
 0x291   : > { %s428_s28 = scalar_lea.sflag [#allocation7], %s427_s22 }
 0x292   : > { %p584_p1 = pneg %p583_p0 }
 0x294   : > { %799 = dma.done.wait (%p584_p1), %s428_s28, 128  }
 0x295   : > { %801 = vsyncadd (%p584_p1), %s428_s28, 4294967168  ;;  %s22_s17 = sadd.s32 1, %s824_s17   ;;  %s1031_s30 = sld [smem:[#allocation17_spill]] }
 0x296   : > { %p19_p2 = scmp.ge.s32.totalorder %s22_s17, 4   ;;  %s1032_s15 = sld [smem:[#allocation15_spill]] }
 0x297   : > { %s1033_s16 = sld [smem:[#allocation16_spill]]  ;;  %s1034_s12 = smov %s808_s13 }
 0x298   : > { %s1035_s13 = smov %s812_s14  ;;  %21 = sbr.rel (!%p19_p2) target bundleno = 10 (0xa), region = 109 }
 0x29b   : > { %s1036_s14 = smov %s1031_s30 }
 0x29d   :  { %434 = vsyncpa [#allocation6], 1 }
 0x29e   :  { %436 = vsyncpa [#allocation6 + $0x1], 1 }
 0x29f   :  { %437 = vsyncpa [#allocation9], 1 }
 0x2a0   :  { %439 = vsyncpa [#allocation9 + $0x1], 1 }
 0x2a1   :  { %440 = vsyncpa [#allocation7], 1 }
 0x2a2   :  { %442 = vsyncpa [#allocation7 + $0x1], 1 }

</bundles_post_ra>
